<compile_context>
chip_gen: v7x
topology: tpu7x:2x2x1
jax: 0.10.0
libtpu: 0.0.40
codegen_flags: <defaults>
</compile_context>

<pallas_src>
import math
import functools

import jax
import jax.numpy as jnp
from jax.experimental import pallas as pl
from jax.experimental.pallas import tpu as pltpu

_GELU_C = math.sqrt(2.0 / math.pi)
_LANE = 128


def _round_up(v, m):
    return (v + m - 1) // m * m


def _gelu_tanh_f32(h):
    # torch.nn.GELU(approximate='tanh'), computed in f32.
    return 0.5 * h * (1.0 + jnp.tanh(_GELU_C * (h + 0.044715 * h * h * h)))


# ----------------------------------------------------------------------------
# Kernels
# ----------------------------------------------------------------------------
def _mlp_kernel_resident(x_ref, w1_ref, b1_ref, w2_ref, b2_ref, o_ref):
    # x_ref : [TM, Dp]   w1_ref: [Dp, Hp]   b1_ref: [1, Hp] (f32)
    # w2_ref: [Hp, Dp]   b2_ref: [1, Dp] (f32)   o_ref: [TM, Dp]
    x = x_ref[...].astype(w1_ref.dtype)                      # bf16 MXU path if bf16 weights
    h = jnp.dot(x, w1_ref[...], preferred_element_type=jnp.float32)
    h = _gelu_tanh_f32(h + b1_ref[...])
    y = jnp.dot(h.astype(w2_ref.dtype), w2_ref[...],
                preferred_element_type=jnp.float32)
    o_ref[...] = (y + b2_ref[...]).astype(o_ref.dtype)


def _mlp_kernel_htiled(x_ref, w1_ref, b1_ref, w2_ref, b2_ref, o_ref, acc_ref):
    # Streams the hidden dim in chunks of th; GELU is elementwise per hidden
    # unit so chunking H is exact.  acc_ref: [TM, Dp] f32 accumulator.
    j = pl.program_id(1)

    @pl.when(j == 0)
    def _():
        acc_ref[...] = jnp.zeros_like(acc_ref)

    x = x_ref[...].astype(w1_ref.dtype)
    h = jnp.dot(x, w1_ref[...], preferred_element_type=jnp.float32)
    h = _gelu_tanh_f32(h + b1_ref[...])
    acc_ref[...] += jnp.dot(h.astype(w2_ref.dtype), w2_ref[...],
                            preferred_element_type=jnp.float32)

    @pl.when(j == pl.num_programs(1) - 1)
    def _():
        o_ref[...] = (acc_ref[...] + b2_ref[...]).astype(o_ref.dtype)


# ----------------------------------------------------------------------------
# Parameter preparation (one-time, outside the hot path)
# ----------------------------------------------------------------------------
def prepare_mlp_params(w1, b1, w2, b2):
    """Lane-pad the weights and pre-cast the biases to f32, once."""
    D, H = w1.shape
    Dp, Hp = _round_up(D, _LANE), _round_up(H, _LANE)
    w1p = jnp.pad(w1, ((0, Dp - D), (0, Hp - H)))
    w2p = jnp.pad(w2, ((0, Hp - H), (0, Dp - D)))
    b1p = jnp.pad(b1.astype(jnp.float32), ((0, Hp - H),)).reshape(1, Hp)
    b2p = jnp.pad(b2.astype(jnp.float32), ((0, Dp - D),)).reshape(1, Dp)
    return w1p, b1p, w2p, b2p


def _vmem_cap_bytes():
    try:
        return int(pltpu.get_tpu_info().vmem_capacity_bytes)
    except Exception:
        return 64 << 20          # conservative (v7x per-TensorCore)


def _const_spec(shape, single_buffer):
    """BlockSpec for a grid-invariant (resident) operand on a 1-D grid."""
    idx = lambda i: tuple(0 for _ in shape)
    if single_buffer:
        try:
            return pl.BlockSpec(shape, idx, pipeline_mode=pl.Buffered(1))
        except Exception:
            pass
    return pl.BlockSpec(shape, idx)


# ----------------------------------------------------------------------------
# Forward wrapper
# ----------------------------------------------------------------------------
@functools.partial(jax.jit, static_argnames=("tm_target", "single_buffer_weights"))
def mlp_forward(x, w1p, b1p, w2p, b2p, *, tm_target=256, single_buffer_weights=True):
    """x: [..., D]; w1p: [Dp, Hp]; b1p: [1, Hp] f32; w2p: [Hp, Dp]; b2p: [1, Dp] f32."""
    orig_shape = x.shape
    D = orig_shape[-1]
    M = math.prod(orig_shape[:-1])
    Dp, Hp = w1p.shape

    x2 = x.reshape(M, D)
    if Dp != D:                                   # exact zero padding of features
        x2 = jnp.pad(x2, ((0, 0), (0, Dp - D)))

    # Row tile: multiple of 8, >=2 row-grid steps whenever M > tm_target.
    tm = max(8, min(int(tm_target), _round_up(M, 8)))
    grid_m = pl.cdiv(M, tm)

    x_it = jnp.dtype(x.dtype).itemsize
    w_it = jnp.dtype(w1p.dtype).itemsize

    cap = _vmem_cap_bytes()
    budget = cap - (12 << 20)

    wbuf = 1 if single_buffer_weights else 2
    wbytes = (w1p.size + w2p.size) * w_it + (b1p.size + b2p.size) * 4
    io_bytes = 2 * tm * Dp * x_it + 2 * tm * Dp * x_it     # x + out tiles, double-buffered
    resident_need = wbuf * wbytes + io_bytes + tm * Hp * 4 + tm * Dp * 4

    cost = pl.CostEstimate(
        flops=int(4 * M * Dp * Hp),               # two matmuls, 2*M*K*N each
        transcendentals=int(M * Hp),              # tanh per hidden activation
        bytes_accessed=int(2 * M * Dp * x_it + wbytes),
    )

    if resident_need <= budget:
        # ---------------- fully-resident weights, 1-D row grid ----------------
        vmem_limit = int(min(cap - (2 << 20),
                             max(resident_need + (8 << 20), 32 << 20)))
        out2 = pl.pallas_call(
            _mlp_kernel_resident,
            out_shape=jax.ShapeDtypeStruct((M, Dp), x.dtype),
            grid_spec=pltpu.PrefetchScalarGridSpec(
                num_scalar_prefetch=0,
                grid=(grid_m,),
                in_specs=[
                    pl.BlockSpec((tm, Dp), lambda i: (i, 0)),        # x tile
                    _const_spec((Dp, Hp), single_buffer_weights),    # W1
                    _const_spec((1, Hp), single_buffer_weights),     # b1
                    _const_spec((Hp, Dp), single_buffer_weights),    # W2
                    _const_spec((1, Dp), single_buffer_weights),     # b2
                ],
                out_specs=pl.BlockSpec((tm, Dp), lambda i: (i, 0)),
            ),
            compiler_params=pltpu.CompilerParams(
                dimension_semantics=("parallel",),
                vmem_limit_bytes=vmem_limit,
            ),
            cost_estimate=cost,
        )(x2, w1p, b1p, w2p, b2p)
    else:
        # ------------- H-tiled path: stream weight slabs, accumulate -----------
        def tiled_need(th):
            return (2 * (Dp * th + th * Dp) * w_it + 2 * th * 4 + Dp * 4
                    + io_bytes + tm * Dp * 4 + tm * th * 4)

        th = 128
        for cand in (4096, 2048, 1024, 512, 256, 128):
            if Hp % cand == 0 and tiled_need(cand) <= budget:
                th = cand
                break
        grid_h = Hp // th
        vmem_limit = int(min(cap - (2 << 20),
                             max(tiled_need(th) + (8 << 20), 32 << 20)))
        out2 = pl.pallas_call(
            _mlp_kernel_htiled,
            out_shape=jax.ShapeDtypeStruct((M, Dp), x.dtype),
            grid_spec=pltpu.PrefetchScalarGridSpec(
                num_scalar_prefetch=0,
                grid=(grid_m, grid_h),
                in_specs=[
                    pl.BlockSpec((tm, Dp), lambda i, j: (i, 0)),     # x tile (resident over j)
                    pl.BlockSpec((Dp, th), lambda i, j: (0, j)),     # W1 slab
                    pl.BlockSpec((1, th), lambda i, j: (0, j)),      # b1 slab
                    pl.BlockSpec((th, Dp), lambda i, j: (j, 0)),     # W2 slab
                    pl.BlockSpec((1, Dp), lambda i, j: (0, 0)),      # b2
                ],
                out_specs=pl.BlockSpec((tm, Dp), lambda i, j: (i, 0)),
                scratch_shapes=[pltpu.VMEM((tm, Dp), jnp.float32)],
            ),
            compiler_params=pltpu.CompilerParams(
                dimension_semantics=("parallel", "arbitrary"),
                vmem_limit_bytes=vmem_limit,
            ),
            cost_estimate=cost,
        )(x2, w1p, b1p, w2p, b2p)

    if Dp != D:
        out2 = out2[:, :D]
    return out2.reshape(orig_shape)


# ----------------------------------------------------------------------------
# Deterministic parameter init (mirrors variance_scaling_: fan_in, trunc-normal)
# ----------------------------------------------------------------------------
def variance_scaling(key, shape, scale, fan_in):
    std = math.sqrt(scale / fan_in) / 0.87962566103423978
    return std * jax.random.truncated_normal(key, -2.0, 2.0, shape, jnp.float32)


def make_mlp_params(key, in_dim, init_scale=0.02, widening_factor=4):
    H = widening_factor * in_dim
    k1, k2 = jax.random.split(key)
    # torch fc1.weight is [H, D] (fan_in = D); store its transpose [D, H]
    w1 = variance_scaling(k1, (H, in_dim), init_scale, fan_in=in_dim).T
    b1 = jnp.zeros((H,), jnp.float32)
    # torch fc2.weight is [D, H] (fan_in = H); store its transpose [H, D]
    w2 = variance_scaling(k2, (in_dim, H), init_scale, fan_in=H).T
    b2 = jnp.zeros((in_dim,), jnp.float32)
    return w1, b1, w2, b2


# ----------------------------------------------------------------------------
# Reference (pure JAX) for a sanity check
# ----------------------------------------------------------------------------
def mlp_reference(x, w1, b1, w2, b2):
    h = x @ w1 + b1
    h = _gelu_tanh_f32(h)
    return h @ w2 + b2


if __name__ == "__main__":
    key = jax.random.PRNGKey(0)
    kx, kp = jax.random.split(key)

    B, T, D = 2, 8, 32          # batch=2, seq=8, in_dim=32, hidden=128
    x = jax.random.normal(kx, (B, T, D), jnp.float32)
    w1, b1, w2, b2 = make_mlp_params(kp, D, init_scale=0.02, widening_factor=4)

    # One-time lane padding / bias pre-cast (outside the jitted hot path).
    params = prepare_mlp_params(w1, b1, w2, b2)

    try:
        out = mlp_forward(x, *params, single_buffer_weights=True)
        out = jax.block_until_ready(out)
    except Exception:
        # Fallback if single-buffered resident weights (pl.Buffered(1)) are not
        # supported by the installed Pallas version.
        out = mlp_forward(x, *params, single_buffer_weights=False)
        out = jax.block_until_ready(out)

    ref = mlp_reference(x, w1, b1, w2, b2)
    assert out.shape == (B, T, D)
    assert jnp.allclose(out, ref, atol=2e-3, rtol=2e-3), "mismatch vs reference"

    print("KERNEL_OK")
</pallas_src>

<mosaic_0001>
module attributes {stable_mosaic.version = 11 : i64} {
  func.func @_mlp_kernel_resident(%arg0: i32, %arg1: memref<16x128xf32, #tpu.memory_space<vmem>>, %arg2: memref<128x128xf32, #tpu.memory_space<vmem>>, %arg3: memref<1x128xf32, #tpu.memory_space<vmem>>, %arg4: memref<128x128xf32, #tpu.memory_space<vmem>>, %arg5: memref<1x128xf32, #tpu.memory_space<vmem>>, %arg6: memref<16x128xf32, #tpu.memory_space<vmem>>) attributes {dimension_semantics = [#tpu.dimension_semantics<parallel>], iteration_bounds = array<i64: 1>, scalar_prefetch = 0 : i64, scratch_operands = 0 : i64, tpu.core_type = #tpu.core_type<tc>, window_params = [{transform_indices = @transform_0, window_bounds = array<i64: 16, 128>}, {pipeline_mode = #tpu.pipeline_mode<synchronous>, transform_indices = @transform_1, window_bounds = array<i64: 128, 128>}, {pipeline_mode = #tpu.pipeline_mode<synchronous>, transform_indices = @transform_2, window_bounds = array<i64: 1, 128>}, {pipeline_mode = #tpu.pipeline_mode<synchronous>, transform_indices = @transform_3, window_bounds = array<i64: 128, 128>}, {pipeline_mode = #tpu.pipeline_mode<synchronous>, transform_indices = @transform_4, window_bounds = array<i64: 1, 128>}, {transform_indices = @transform_5, window_bounds = array<i64: 16, 128>}]} {
    %c0 = arith.constant 0 : index
    %c0_0 = arith.constant 0 : index
    %0 = vector.load %arg1[%c0, %c0_0] : memref<16x128xf32, #tpu.memory_space<vmem>>, vector<16x128xf32>
    %c0_1 = arith.constant 0 : index
    %c0_2 = arith.constant 0 : index
    %1 = vector.load %arg2[%c0_1, %c0_2] : memref<128x128xf32, #tpu.memory_space<vmem>>, vector<128x128xf32>
    %cst = arith.constant dense<0.000000e+00> : vector<16x128xf32>
    %2 = tpu.matmul %0, %1, %cst {dimension_numbers = #tpu.dot_dimension_numbers<[1], [0], [0], [1], [0, 0, 1, 1], [], []>} : vector<16x128xf32>, vector<128x128xf32>, vector<16x128xf32> -> vector<16x128xf32>
    %c0_3 = arith.constant 0 : index
    %c0_4 = arith.constant 0 : index
    %3 = vector.load %arg3[%c0_3, %c0_4] : memref<1x128xf32, #tpu.memory_space<vmem>>, vector<1x128xf32>
    %4 = vector.broadcast %3 : vector<1x128xf32> to vector<16x128xf32>
    %5 = arith.addf %2, %4 : vector<16x128xf32>
    %cst_5 = arith.constant 5.000000e-01 : f32
    %6 = vector.broadcast %cst_5 : f32 to vector<16x128xf32>
    %7 = arith.mulf %6, %5 : vector<16x128xf32>
    %cst_6 = arith.constant 4.471500e-02 : f32
    %8 = vector.broadcast %cst_6 : f32 to vector<16x128xf32>
    %9 = arith.mulf %8, %5 : vector<16x128xf32>
    %10 = arith.mulf %9, %5 : vector<16x128xf32>
    %11 = arith.mulf %10, %5 : vector<16x128xf32>
    %12 = arith.addf %5, %11 : vector<16x128xf32>
    %cst_7 = arith.constant 0.797884583 : f32
    %13 = vector.broadcast %cst_7 : f32 to vector<16x128xf32>
    %14 = arith.mulf %13, %12 : vector<16x128xf32>
    %15 = math.tanh %14 : vector<16x128xf32>
    %cst_8 = arith.constant 1.000000e+00 : f32
    %16 = vector.broadcast %cst_8 : f32 to vector<16x128xf32>
    %17 = arith.addf %16, %15 : vector<16x128xf32>
    %18 = arith.mulf %7, %17 : vector<16x128xf32>
    %c0_9 = arith.constant 0 : index
    %c0_10 = arith.constant 0 : index
    %19 = vector.load %arg4[%c0_9, %c0_10] : memref<128x128xf32, #tpu.memory_space<vmem>>, vector<128x128xf32>
    %cst_11 = arith.constant dense<0.000000e+00> : vector<16x128xf32>
    %20 = tpu.matmul %18, %19, %cst_11 {dimension_numbers = #tpu.dot_dimension_numbers<[1], [0], [0], [1], [0, 0, 1, 1], [], []>} : vector<16x128xf32>, vector<128x128xf32>, vector<16x128xf32> -> vector<16x128xf32>
    %c0_12 = arith.constant 0 : index
    %c0_13 = arith.constant 0 : index
    %21 = vector.load %arg5[%c0_12, %c0_13] : memref<1x128xf32, #tpu.memory_space<vmem>>, vector<1x128xf32>
    %22 = vector.broadcast %21 : vector<1x128xf32> to vector<16x128xf32>
    %23 = arith.addf %20, %22 : vector<16x128xf32>
    %c0_14 = arith.constant 0 : index
    %c0_15 = arith.constant 0 : index
    %24 = vector.load %arg6[%c0_14, %c0_15] : memref<16x128xf32, #tpu.memory_space<vmem>>, vector<16x128xf32>
    tpu.vector_store %arg6[%c0_14, %c0_15], %23 {strides = array<i32>} : memref<16x128xf32, #tpu.memory_space<vmem>>, vector<16x128xf32>,
    return
  }
  func.func @transform_0(%arg0: i32) -> (i32, i32) {
    %c0_i32 = arith.constant 0 : i32
    %c0_i32_0 = arith.constant 0 : i32
    return %arg0, %c0_i32 : i32, i32
  }
  func.func @transform_1(%arg0: i32) -> (i32, i32) {
    %c0_i32 = arith.constant 0 : i32
    %c0_i32_0 = arith.constant 0 : i32
    %c0_i32_1 = arith.constant 0 : i32
    return %c0_i32, %c0_i32_0 : i32, i32
  }
  func.func @transform_2(%arg0: i32) -> (i32, i32) {
    %c0_i32 = arith.constant 0 : i32
    %c0_i32_0 = arith.constant 0 : i32
    %c0_i32_1 = arith.constant 0 : i32
    return %c0_i32, %c0_i32_0 : i32, i32
  }
  func.func @transform_3(%arg0: i32) -> (i32, i32) {
    %c0_i32 = arith.constant 0 : i32
    %c0_i32_0 = arith.constant 0 : i32
    %c0_i32_1 = arith.constant 0 : i32
    return %c0_i32, %c0_i32_0 : i32, i32
  }
  func.func @transform_4(%arg0: i32) -> (i32, i32) {
    %c0_i32 = arith.constant 0 : i32
    %c0_i32_0 = arith.constant 0 : i32
    %c0_i32_1 = arith.constant 0 : i32
    return %c0_i32, %c0_i32_0 : i32, i32
  }
  func.func @transform_5(%arg0: i32) -> (i32, i32) {
    %c0_i32 = arith.constant 0 : i32
    %c0_i32_0 = arith.constant 0 : i32
    return %arg0, %c0_i32 : i32, i32
  }
}

module attributes {stable_mosaic.version = 11 : i64} {
  func.func @_mlp_kernel_resident(%arg0: i32, %arg1: memref<16x128xf32, #tpu.memory_space<vmem>>, %arg2: memref<128x128xf32, #tpu.memory_space<vmem>>, %arg3: memref<1x128xf32, #tpu.memory_space<vmem>>, %arg4: memref<128x128xf32, #tpu.memory_space<vmem>>, %arg5: memref<1x128xf32, #tpu.memory_space<vmem>>, %arg6: memref<16x128xf32, #tpu.memory_space<vmem>>) attributes {dimension_semantics = [#tpu.dimension_semantics<parallel>], iteration_bounds = array<i64: 1>, scalar_prefetch = 0 : i64, scratch_operands = 0 : i64, tpu.core_type = #tpu.core_type<tc>, window_params = [{transform_indices = @transform_0, window_bounds = array<i64: 16, 128>}, {pipeline_mode = #tpu.pipeline_mode<synchronous>, transform_indices = @transform_1, window_bounds = array<i64: 128, 128>}, {pipeline_mode = #tpu.pipeline_mode<synchronous>, transform_indices = @transform_2, window_bounds = array<i64: 1, 128>}, {pipeline_mode = #tpu.pipeline_mode<synchronous>, transform_indices = @transform_3, window_bounds = array<i64: 128, 128>}, {pipeline_mode = #tpu.pipeline_mode<synchronous>, transform_indices = @transform_4, window_bounds = array<i64: 1, 128>}, {transform_indices = @transform_5, window_bounds = array<i64: 16, 128>}]} {
    %c0 = arith.constant 0 : index
    %c0_0 = arith.constant 0 : index
    %0 = vector.load %arg1[%c0, %c0_0] : memref<16x128xf32, #tpu.memory_space<vmem>>, vector<16x128xf32>
    %c0_1 = arith.constant 0 : index
    %c0_2 = arith.constant 0 : index
    %1 = vector.load %arg2[%c0_1, %c0_2] : memref<128x128xf32, #tpu.memory_space<vmem>>, vector<128x128xf32>
    %cst = arith.constant dense<0.000000e+00> : vector<16x128xf32>
    %2 = tpu.matmul %0, %1, %cst {dimension_numbers = #tpu.dot_dimension_numbers<[1], [0], [0], [1], [0, 0, 1, 1], [], []>} : vector<16x128xf32>, vector<128x128xf32>, vector<16x128xf32> -> vector<16x128xf32>
    %c0_3 = arith.constant 0 : index
    %c0_4 = arith.constant 0 : index
    %3 = vector.load %arg3[%c0_3, %c0_4] : memref<1x128xf32, #tpu.memory_space<vmem>>, vector<1x128xf32>
    %4 = vector.broadcast %3 : vector<1x128xf32> to vector<16x128xf32>
    %5 = arith.addf %2, %4 : vector<16x128xf32>
    %cst_5 = arith.constant 5.000000e-01 : f32
    %6 = vector.broadcast %cst_5 : f32 to vector<16x128xf32>
    %7 = arith.mulf %6, %5 : vector<16x128xf32>
    %cst_6 = arith.constant 4.471500e-02 : f32
    %8 = vector.broadcast %cst_6 : f32 to vector<16x128xf32>
    %9 = arith.mulf %8, %5 : vector<16x128xf32>
    %10 = arith.mulf %9, %5 : vector<16x128xf32>
    %11 = arith.mulf %10, %5 : vector<16x128xf32>
    %12 = arith.addf %5, %11 : vector<16x128xf32>
    %cst_7 = arith.constant 0.797884583 : f32
    %13 = vector.broadcast %cst_7 : f32 to vector<16x128xf32>
    %14 = arith.mulf %13, %12 : vector<16x128xf32>
    %15 = math.tanh %14 : vector<16x128xf32>
    %cst_8 = arith.constant 1.000000e+00 : f32
    %16 = vector.broadcast %cst_8 : f32 to vector<16x128xf32>
    %17 = arith.addf %16, %15 : vector<16x128xf32>
    %18 = arith.mulf %7, %17 : vector<16x128xf32>
    %c0_9 = arith.constant 0 : index
    %c0_10 = arith.constant 0 : index
    %19 = vector.load %arg4[%c0_9, %c0_10] : memref<128x128xf32, #tpu.memory_space<vmem>>, vector<128x128xf32>
    %cst_11 = arith.constant dense<0.000000e+00> : vector<16x128xf32>
    %20 = tpu.matmul %18, %19, %cst_11 {dimension_numbers = #tpu.dot_dimension_numbers<[1], [0], [0], [1], [0, 0, 1, 1], [], []>} : vector<16x128xf32>, vector<128x128xf32>, vector<16x128xf32> -> vector<16x128xf32>
    %c0_12 = arith.constant 0 : index
    %c0_13 = arith.constant 0 : index
    %21 = vector.load %arg5[%c0_12, %c0_13] : memref<1x128xf32, #tpu.memory_space<vmem>>, vector<1x128xf32>
    %22 = vector.broadcast %21 : vector<1x128xf32> to vector<16x128xf32>
    %23 = arith.addf %20, %22 : vector<16x128xf32>
    %c0_14 = arith.constant 0 : index
    %c0_15 = arith.constant 0 : index
    %24 = vector.load %arg6[%c0_14, %c0_15] : memref<16x128xf32, #tpu.memory_space<vmem>>, vector<16x128xf32>
    tpu.vector_store %arg6[%c0_14, %c0_15], %23 {strides = array<i32>} : memref<16x128xf32, #tpu.memory_space<vmem>>, vector<16x128xf32>,
    return
  }
  func.func @transform_0(%arg0: i32) -> (i32, i32) {
    %c0_i32 = arith.constant 0 : i32
    %c0_i32_0 = arith.constant 0 : i32
    return %arg0, %c0_i32 : i32, i32
  }
  func.func @transform_1(%arg0: i32) -> (i32, i32) {
    %c0_i32 = arith.constant 0 : i32
    %c0_i32_0 = arith.constant 0 : i32
    %c0_i32_1 = arith.constant 0 : i32
    return %c0_i32, %c0_i32_0 : i32, i32
  }
  func.func @transform_2(%arg0: i32) -> (i32, i32) {
    %c0_i32 = arith.constant 0 : i32
    %c0_i32_0 = arith.constant 0 : i32
    %c0_i32_1 = arith.constant 0 : i32
    return %c0_i32, %c0_i32_0 : i32, i32
  }
  func.func @transform_3(%arg0: i32) -> (i32, i32) {
    %c0_i32 = arith.constant 0 : i32
    %c0_i32_0 = arith.constant 0 : i32
    %c0_i32_1 = arith.constant 0 : i32
    return %c0_i32, %c0_i32_0 : i32, i32
  }
  func.func @transform_4(%arg0: i32) -> (i32, i32) {
    %c0_i32 = arith.constant 0 : i32
    %c0_i32_0 = arith.constant 0 : i32
    %c0_i32_1 = arith.constant 0 : i32
    return %c0_i32, %c0_i32_0 : i32, i32
  }
  func.func @transform_5(%arg0: i32) -> (i32, i32) {
    %c0_i32 = arith.constant 0 : i32
    %c0_i32_0 = arith.constant 0 : i32
    return %arg0, %c0_i32 : i32, i32
  }
}

</mosaic_0001>

<bundles_post_ra>
// kernel: mlp_forward.1
= control target key start
LH: loop header
LB: loop body
LE: loop exit
PB: predicated region body
PF: predicated region fallthrough
CT: control target
= control target key end

     0   :  { %10 = vsyncpa [#allocation3], 0  ;;  %s576_s0 = inlined_call_operand.vmem [shape: f32[16,128], index: 0, kind: input, shape index: {}]   ;;  %s577_s1 = inlined_call_operand.hbm [shape: f32[128,128], index: 1, kind: input, shape index: {}]   ;;  %s578_s2 = inlined_call_operand.vmem [shape: f32[1,128], index: 2, kind: input, shape index: {}]   ;;  %s579_s3 = inlined_call_operand.hbm [shape: f32[128,128], index: 3, kind: input, shape index: {}]   ;;  %s580_s4 = inlined_call_operand.vmem [shape: f32[1,128], index: 4, kind: input, shape index: {}]   ;;  %s581_s5 = inlined_call_operand.vmem [shape: f32[16,128], index: 5, kind: output, shape index: {}]  }
   0x1   :  { %11 = vsyncpa [#allocation5], 0  ;;  %s500_s18 = smov [#allocation2]   ;;  %s452_s22 = scalar_lea.hbm %s577_s1, 2048 }
   0x2   :  { %s19_s19 = sshll.u32 %s500_s18, 4  ;;  %p453_p0 = scmp.ne.s32.totalorder %s577_s1, %s452_s22  ;;  %s20_s19 = int_to_ptr.vmem [resolvable:$true] %s19_s19 }
   0x3   :  { %p456_p1 = scmp.lt.u32.totalorder %s452_s22, %s577_s1 }
   0x5   :  { %p458_p2 = pnand %p456_p1, %p453_p0 }
   0x7   :  { %461 = shalt.err (!%p458_p2)
}
   0x8   :  { %s462_s27 = scalar_lea.vmem %s20_s19, 2048  ;;  %p467_p4 = scmp.lt.s32.totalorder %s20_s19, %s20_s19 }
   0x9   :  { %p463_p3 = scmp.ne.s32.totalorder %s20_s19, %s462_s27  ;;  %p468_p5 = scmp.lt.s32.totalorder %s462_s27, %s462_s27 }
   0xb   :  { %p469_p6 = por %p468_p5, %p467_p4 }
   0xd   :  { %p470_p7 = pnand %p469_p6, %p463_p3 }
   0xf   :  { %473 = shalt.err (!%p470_p7)
}
  0x10   :  { %s501_s28 = smov 128   ;;  %s502_s29 = smov 8  }
  0x11   :  { %25 = dma.hbm_to_vmem [thread:$0]  %s577_s1, 2048, %s20_s19, [#allocation3], %s501_s28, %s501_s28, %s502_s29  }
  0x12   :  { %s503_s7 = smov [#allocation4]   ;;  %s474_s11 = scalar_lea.hbm %s579_s3, 2048 }
  0x13   :  { %s33_s8 = sshll.u32 %s503_s7, 4  ;;  %p475_p8 = scmp.ne.s32.totalorder %s579_s3, %s474_s11  ;;  %s34_s8 = int_to_ptr.vmem [resolvable:$true] %s33_s8 }
  0x14   :  { %p478_p9 = scmp.lt.u32.totalorder %s474_s11, %s579_s3 }
  0x16   :  { %p480_p10 = pnand %p478_p9, %p475_p8 }
  0x18   :  { %483 = shalt.err (!%p480_p10)
}
  0x19   :  { %s484_s16 = scalar_lea.vmem %s34_s8, 2048  ;;  %p489_p12 = scmp.lt.s32.totalorder %s34_s8, %s34_s8 }
  0x1a   :  { %p485_p11 = scmp.ne.s32.totalorder %s34_s8, %s484_s16  ;;  %p490_p13 = scmp.lt.s32.totalorder %s484_s16, %s484_s16 }
  0x1c   :  { %p491_p0 = por %p490_p13, %p489_p12 }
  0x1e   :  { %p492_p1 = pnand %p491_p0, %p485_p11 }
  0x20   :  { %495 = shalt.err (!%p492_p1)
}
  0x21   :  { %39 = dma.hbm_to_vmem [thread:$0]  %s579_s3, 2048, %s34_s8, [#allocation5], %s501_s28, %s501_s28, %s502_s29  }
  0x22   :  { %496 = dma.done.wait [#allocation3], 2048  }
  0x23   :  { %497 = vsyncadd [#allocation3], 4294965248 }
  0x24   :  { %498 = dma.done.wait [#allocation5], 2048  }
  0x25   :  { %499 = vsyncadd [#allocation5], 4294965248  ;;  %v50_v0 = vld [vmem:[#allocation2] sm:$0xff]  ;;  %v51_v1 = vld [vmem:[#allocation2 + $0x8] sm:$0xff] }
  0x26   :  { %v52_v2 = vld [vmem:[#allocation2 + $0x10] sm:$0xff]  ;;  %v380_v3 = vpack.c.bf16 %v51_v1, %v50_v0  ;;  %v53_v4 = vld [vmem:[#allocation2 + $0x18] sm:$0xff]  ;;  %v54_v6 = vld [vmem:[#allocation2 + $0x20] sm:$0xff] }
  0x27   :  { %v384_v5 = vpack.c.bf16 %v53_v4, %v52_v2  ;;  %v55_v7 = vld [vmem:[#allocation2 + $0x28] sm:$0xff]  ;;  %v56_v9 = vld [vmem:[#allocation2 + $0x30] sm:$0xff]  ;;  %v48_v10 = vld [vmem:[%s576_s0] sm:$0xff] }
  0x28   :  { %381 = vmatprep.subr.bf16.mxu0 %v380_v3  ;;  %v388_v8 = vpack.c.bf16 %v55_v7, %v54_v6  ;;  %v57_v11 = vld [vmem:[#allocation2 + $0x38] sm:$0xff]  ;;  %342 = vmatprep.mubr.f32.mxu0 %v48_v10  ;;  %v166_v12 = vld [vmem:[#allocation4] sm:$0xff]  ;;  %v167_v13 = vld [vmem:[#allocation4 + $0x8] sm:$0xff] }
  0x29   :  { %383 = vmatpush3.bf16.msra.mxu0 %v380_v3  ;;  %v412_v14 = vpack.c.bf16 %v167_v13, %v166_v12  ;;  %v392_v15 = vpack.c.bf16 %v57_v11, %v56_v9  ;;  %v58_v16 = vld [vmem:[#allocation2 + $0x40] sm:$0xff]  ;;  %v59_v17 = vld [vmem:[#allocation2 + $0x48] sm:$0xff]  ;;  %v60_v19 = vld [vmem:[#allocation2 + $0x50] sm:$0xff] }
  0x2a   :  { %385 = vmatprep.subr.bf16.mxu0 %v384_v5  ;;  %v396_v18 = vpack.c.bf16 %v59_v17, %v58_v16  ;;  %v61_v20 = vld [vmem:[#allocation2 + $0x58] sm:$0xff]  ;;  %v62_v22 = vld [vmem:[#allocation2 + $0x60] sm:$0xff]  ;;  %v63_v23 = vld [vmem:[#allocation2 + $0x68] sm:$0xff] }
  0x2b   :  { %413 = vmatprep.subr.bf16.mxu1 %v412_v14  ;;  %v400_v21 = vpack.c.bf16 %v61_v20, %v60_v19  ;;  %v404_v24 = vpack.c.bf16 %v63_v23, %v62_v22  ;;  %v64_v25 = vld [vmem:[#allocation2 + $0x70] sm:$0xff]  ;;  %v65_v26 = vld [vmem:[#allocation2 + $0x78] sm:$0xff]  ;;  %v49_v28 = vld [vmem:[%s576_s0 + $0x8] sm:$0xff] }
  0x2c   :  { %415 = vmatpush3.bf16.msra.mxu1 %v412_v14  ;;  %v408_v27 = vpack.c.bf16 %v65_v26, %v64_v25  ;;  %v168_v29 = vld [vmem:[#allocation4 + $0x10] sm:$0xff]  ;;  %v169_v30 = vld [vmem:[#allocation4 + $0x18] sm:$0xff]  ;;  %v170_v32 = vld [vmem:[#allocation4 + $0x20] sm:$0xff] }
  0x2d   :  { %387 = vmatpush3.bf16.msra.mxu0 %v384_v5  ;;  %v416_v31 = vpack.c.bf16 %v169_v30, %v168_v29  ;;  %v171_v33 = vld [vmem:[#allocation4 + $0x28] sm:$0xff]  ;;  %v172_v35 = vld [vmem:[#allocation4 + $0x30] sm:$0xff]  ;;  %v173_v36 = vld [vmem:[#allocation4 + $0x38] sm:$0xff] }
  0x2e   :  { %389 = vmatprep.subr.bf16.mxu0 %v388_v8  ;;  %v420_v34 = vpack.c.bf16 %v171_v33, %v170_v32  ;;  %v174_v37 = vld [vmem:[#allocation4 + $0x40] sm:$0xff]  ;;  %v424_v38 = vpack.c.bf16 %v173_v36, %v172_v35  ;;  %v175_v39 = vld [vmem:[#allocation4 + $0x48] sm:$0xff]  ;;  %v176_v41 = vld [vmem:[#allocation4 + $0x50] sm:$0xff] }
  0x2f   :  { %417 = vmatprep.subr.bf16.mxu1 %v416_v31  ;;  %v428_v40 = vpack.c.bf16 %v175_v39, %v174_v37  ;;  %v177_v42 = vld [vmem:[#allocation4 + $0x58] sm:$0xff]  ;;  %v178_v44 = vld [vmem:[#allocation4 + $0x60] sm:$0xff]  ;;  %v179_v45 = vld [vmem:[#allocation4 + $0x68] sm:$0xff] }
  0x30   :  { %419 = vmatpush3.bf16.msra.mxu1 %v416_v31  ;;  %v432_v43 = vpack.c.bf16 %v177_v42, %v176_v41  ;;  %v436_v46 = vpack.c.bf16 %v179_v45, %v178_v44  ;;  %v180_v47 = vld [vmem:[#allocation4 + $0x70] sm:$0xff]  ;;  %v181_v48 = vld [vmem:[#allocation4 + $0x78] sm:$0xff]  ;;  %v272_v50 = vld [vmem:[%s578_s2] ss:$0 sm:$0xff] }
  0x31   :  { %391 = vmatpush3.bf16.msra.mxu0 %v388_v8  ;;  %421 = vmatprep.subr.bf16.mxu1 %v420_v34  ;;  %v440_v49 = vpack.c.bf16 %v181_v48, %v180_v47  ;;  %v273_v9 = vld [vmem:[%s580_s4] ss:$0 sm:$0xff] }
  0x32   :  { %393 = vmatprep.subr.bf16.mxu0 %v392_v15 }
  0x34   :  { %423 = vmatpush3.bf16.msra.mxu1 %v420_v34 }
  0x35   :  { %395 = vmatpush3.bf16.msra.mxu0 %v392_v15  ;;  %425 = vmatprep.subr.bf16.mxu1 %v424_v38 }
  0x36   :  { %397 = vmatprep.subr.bf16.mxu0 %v396_v18 }
  0x38   :  { %427 = vmatpush3.bf16.msra.mxu1 %v424_v38 }
  0x39   :  { %399 = vmatpush3.bf16.msra.mxu0 %v396_v18  ;;  %429 = vmatprep.subr.bf16.mxu1 %v428_v40 }
  0x3a   :  { %401 = vmatprep.subr.bf16.mxu0 %v400_v21 }
  0x3c   :  { %431 = vmatpush3.bf16.msra.mxu1 %v428_v40 }
  0x3d   :  { %403 = vmatpush3.bf16.msra.mxu0 %v400_v21  ;;  %433 = vmatprep.subr.bf16.mxu1 %v432_v43 }
  0x3e   :  { %405 = vmatprep.subr.bf16.mxu0 %v404_v24 }
  0x40   :  { %435 = vmatpush3.bf16.msra.mxu1 %v432_v43 }
  0x41   :  { %407 = vmatpush3.bf16.msra.mxu0 %v404_v24  ;;  %437 = vmatprep.subr.bf16.mxu1 %v436_v46 }
  0x42   :  { %409 = vmatprep.subr.bf16.mxu0 %v408_v27 }
  0x44   :  { %439 = vmatpush3.bf16.msra.mxu1 %v436_v46 }
  0x45   :  { %411 = vmatpush3.bf16.msra.mxu0 %v408_v27  ;;  %441 = vmatprep.subr.bf16.mxu1 %v440_v49 }
  0x48   :  { %343 = vmatmul.mubr.f32.vlgmr.msra.gmra.mrb[0].mxu0 %v49_v28  ;;  %443 = vmatpush3.bf16.msra.mxu1 %v440_v49 }
 0x11b   :  { %v344_v51 = vpop.f32.mrb[0].mxu0 }
 0x11c   :  { %v145_v52 = vadd.f32 %v344_v51, %v272_v50  ;;  %v139_v53 = vpop.f32.mrb[1].mxu0 }
 0x11d   :  { %v140_v54 = vadd.f32 %v272_v50, %v139_v53 }
 0x11e   :  { %v151_v55 = vmul.f32 0.044715, %v145_v52  ;;  %v149_v6 = vmul.f32 0.5, %v145_v52 }
 0x11f   :  { %v150_v56 = vmul.f32 0.044715, %v140_v54  ;;  %v148_v4 = vmul.f32 0.5, %v140_v54 }
 0x120   :  { %v153_v57 = vmul.f32 %v151_v55, %v145_v52 }
 0x121   :  { %v152_v58 = vmul.f32 %v150_v56, %v140_v54 }
 0x122   :  { %v155_v59 = vmul.f32 %v153_v57, %v145_v52 }
 0x123   :  { %v154_v60 = vmul.f32 %v152_v58, %v140_v54 }
 0x124   :  { %v157_v61 = vadd.f32 %v155_v59, %v145_v52 }
 0x125   :  { %v156_v62 = vadd.f32 %v154_v60, %v140_v54 }
 0x126   :  { %v159_v63 = vmul.f32 0.7978846, %v157_v61 }
 0x127   :  { %v158_v0 = vmul.f32 0.7978846, %v156_v62 }
 0x128   :  { %448 = vtanh.f32 %v159_v63 }
 0x129   :  { %450 = vtanh.f32 %v158_v0 }
 0x132   :  { %v449_v1 = vpop.eup %448 }
 0x133   :  { %v451_v2 = vpop.eup %450  ;;  %v163_v3 = vadd.f32 1.0, %v449_v1 }
 0x134   :  { %v162_v5 = vadd.f32 1.0, %v451_v2 }
 0x135   :  { %v165_v8 = vmul.f32 %v163_v3, %v149_v6 }
 0x136   :  { %v164_v7 = vmul.f32 %v162_v5, %v148_v4 }
 0x138   :  { %377 = vmatprep.mubr.f32.mxu1 %v164_v7 }
 0x139   :  { %378 = vmatmul.mubr.f32.vlgmr.msra.gmra.mrb[0].mxu1 %v165_v8 }
 0x20c   :  { %v379_v10 = vpop.f32.mrb[0].mxu1 }
 0x20d   :  { %v261_v11 = vadd.f32 %v379_v10, %v273_v9  ;;  %v255_v12 = vpop.f32.mrb[1].mxu1 }
 0x20e   :  { %v256_v13 = vadd.f32 %v273_v9, %v255_v12 }
 0x20f   :  { %265 = vst [vmem:[%s581_s5 + $0x8] sm:$0xff] %v261_v11 }
 0x210   :  { %264 = vst [vmem:[%s581_s5] sm:$0xff] %v256_v13 }
 0x211   :  { %270 = vsyncpa [#allocation3], 1 }
 0x212   :  { %271 = vsyncpa [#allocation5], 1 }

// kernel: mlp_forward.1
= control target key start
LH: loop header
LB: loop body
LE: loop exit
PB: predicated region body
PF: predicated region fallthrough
CT: control target
= control target key end

     0   :  { %10 = vsyncpa [#allocation3], 0  ;;  %s576_s0 = inlined_call_operand.vmem [shape: f32[16,128], index: 0, kind: input, shape index: {}]   ;;  %s577_s1 = inlined_call_operand.hbm [shape: f32[128,128], index: 1, kind: input, shape index: {}]   ;;  %s578_s2 = inlined_call_operand.vmem [shape: f32[1,128], index: 2, kind: input, shape index: {}]   ;;  %s579_s3 = inlined_call_operand.hbm [shape: f32[128,128], index: 3, kind: input, shape index: {}]   ;;  %s580_s4 = inlined_call_operand.vmem [shape: f32[1,128], index: 4, kind: input, shape index: {}]   ;;  %s581_s5 = inlined_call_operand.vmem [shape: f32[16,128], index: 5, kind: output, shape index: {}]  }
   0x1   :  { %11 = vsyncpa [#allocation5], 0  ;;  %s500_s18 = smov [#allocation2]   ;;  %s452_s22 = scalar_lea.hbm %s577_s1, 2048 }
   0x2   :  { %s19_s19 = sshll.u32 %s500_s18, 4  ;;  %p453_p0 = scmp.ne.s32.totalorder %s577_s1, %s452_s22  ;;  %s20_s19 = int_to_ptr.vmem [resolvable:$true] %s19_s19 }
   0x3   :  { %p456_p1 = scmp.lt.u32.totalorder %s452_s22, %s577_s1 }
   0x5   :  { %p458_p2 = pnand %p456_p1, %p453_p0 }
   0x7   :  { %461 = shalt.err (!%p458_p2)
}
   0x8   :  { %s462_s27 = scalar_lea.vmem %s20_s19, 2048  ;;  %p467_p4 = scmp.lt.s32.totalorder %s20_s19, %s20_s19 }
   0x9   :  { %p463_p3 = scmp.ne.s32.totalorder %s20_s19, %s462_s27  ;;  %p468_p5 = scmp.lt.s32.totalorder %s462_s27, %s462_s27 }
   0xb   :  { %p469_p6 = por %p468_p5, %p467_p4 }
   0xd   :  { %p470_p7 = pnand %p469_p6, %p463_p3 }
   0xf   :  { %473 = shalt.err (!%p470_p7)
}
  0x10   :  { %s501_s28 = smov 128   ;;  %s502_s29 = smov 8  }
  0x11   :  { %25 = dma.hbm_to_vmem [thread:$0]  %s577_s1, 2048, %s20_s19, [#allocation3], %s501_s28, %s501_s28, %s502_s29  }
  0x12   :  { %s503_s7 = smov [#allocation4]   ;;  %s474_s11 = scalar_lea.hbm %s579_s3, 2048 }
  0x13   :  { %s33_s8 = sshll.u32 %s503_s7, 4  ;;  %p475_p8 = scmp.ne.s32.totalorder %s579_s3, %s474_s11  ;;  %s34_s8 = int_to_ptr.vmem [resolvable:$true] %s33_s8 }
  0x14   :  { %p478_p9 = scmp.lt.u32.totalorder %s474_s11, %s579_s3 }
  0x16   :  { %p480_p10 = pnand %p478_p9, %p475_p8 }
  0x18   :  { %483 = shalt.err (!%p480_p10)
}
  0x19   :  { %s484_s16 = scalar_lea.vmem %s34_s8, 2048  ;;  %p489_p12 = scmp.lt.s32.totalorder %s34_s8, %s34_s8 }
  0x1a   :  { %p485_p11 = scmp.ne.s32.totalorder %s34_s8, %s484_s16  ;;  %p490_p13 = scmp.lt.s32.totalorder %s484_s16, %s484_s16 }
  0x1c   :  { %p491_p0 = por %p490_p13, %p489_p12 }
  0x1e   :  { %p492_p1 = pnand %p491_p0, %p485_p11 }
  0x20   :  { %495 = shalt.err (!%p492_p1)
}
  0x21   :  { %39 = dma.hbm_to_vmem [thread:$0]  %s579_s3, 2048, %s34_s8, [#allocation5], %s501_s28, %s501_s28, %s502_s29  }
  0x22   :  { %496 = dma.done.wait [#allocation3], 2048  }
  0x23   :  { %497 = vsyncadd [#allocation3], 4294965248 }
  0x24   :  { %498 = dma.done.wait [#allocation5], 2048  }
  0x25   :  { %499 = vsyncadd [#allocation5], 4294965248  ;;  %v50_v0 = vld [vmem:[#allocation2] sm:$0xff]  ;;  %v51_v1 = vld [vmem:[#allocation2 + $0x8] sm:$0xff] }
  0x26   :  { %v52_v2 = vld [vmem:[#allocation2 + $0x10] sm:$0xff]  ;;  %v380_v3 = vpack.c.bf16 %v51_v1, %v50_v0  ;;  %v53_v4 = vld [vmem:[#allocation2 + $0x18] sm:$0xff]  ;;  %v54_v6 = vld [vmem:[#allocation2 + $0x20] sm:$0xff] }
  0x27   :  { %v384_v5 = vpack.c.bf16 %v53_v4, %v52_v2  ;;  %v55_v7 = vld [vmem:[#allocation2 + $0x28] sm:$0xff]  ;;  %v56_v9 = vld [vmem:[#allocation2 + $0x30] sm:$0xff]  ;;  %v48_v10 = vld [vmem:[%s576_s0] sm:$0xff] }
  0x28   :  { %381 = vmatprep.subr.bf16.mxu0 %v380_v3  ;;  %v388_v8 = vpack.c.bf16 %v55_v7, %v54_v6  ;;  %v57_v11 = vld [vmem:[#allocation2 + $0x38] sm:$0xff]  ;;  %342 = vmatprep.mubr.f32.mxu0 %v48_v10  ;;  %v166_v12 = vld [vmem:[#allocation4] sm:$0xff]  ;;  %v167_v13 = vld [vmem:[#allocation4 + $0x8] sm:$0xff] }
  0x29   :  { %383 = vmatpush3.bf16.msra.mxu0 %v380_v3  ;;  %v412_v14 = vpack.c.bf16 %v167_v13, %v166_v12  ;;  %v392_v15 = vpack.c.bf16 %v57_v11, %v56_v9  ;;  %v58_v16 = vld [vmem:[#allocation2 + $0x40] sm:$0xff]  ;;  %v59_v17 = vld [vmem:[#allocation2 + $0x48] sm:$0xff]  ;;  %v60_v19 = vld [vmem:[#allocation2 + $0x50] sm:$0xff] }
  0x2a   :  { %385 = vmatprep.subr.bf16.mxu0 %v384_v5  ;;  %v396_v18 = vpack.c.bf16 %v59_v17, %v58_v16  ;;  %v61_v20 = vld [vmem:[#allocation2 + $0x58] sm:$0xff]  ;;  %v62_v22 = vld [vmem:[#allocation2 + $0x60] sm:$0xff]  ;;  %v63_v23 = vld [vmem:[#allocation2 + $0x68] sm:$0xff] }
  0x2b   :  { %413 = vmatprep.subr.bf16.mxu1 %v412_v14  ;;  %v400_v21 = vpack.c.bf16 %v61_v20, %v60_v19  ;;  %v404_v24 = vpack.c.bf16 %v63_v23, %v62_v22  ;;  %v64_v25 = vld [vmem:[#allocation2 + $0x70] sm:$0xff]  ;;  %v65_v26 = vld [vmem:[#allocation2 + $0x78] sm:$0xff]  ;;  %v49_v28 = vld [vmem:[%s576_s0 + $0x8] sm:$0xff] }
  0x2c   :  { %415 = vmatpush3.bf16.msra.mxu1 %v412_v14  ;;  %v408_v27 = vpack.c.bf16 %v65_v26, %v64_v25  ;;  %v168_v29 = vld [vmem:[#allocation4 + $0x10] sm:$0xff]  ;;  %v169_v30 = vld [vmem:[#allocation4 + $0x18] sm:$0xff]  ;;  %v170_v32 = vld [vmem:[#allocation4 + $0x20] sm:$0xff] }
  0x2d   :  { %387 = vmatpush3.bf16.msra.mxu0 %v384_v5  ;;  %v416_v31 = vpack.c.bf16 %v169_v30, %v168_v29  ;;  %v171_v33 = vld [vmem:[#allocation4 + $0x28] sm:$0xff]  ;;  %v172_v35 = vld [vmem:[#allocation4 + $0x30] sm:$0xff]  ;;  %v173_v36 = vld [vmem:[#allocation4 + $0x38] sm:$0xff] }
  0x2e   :  { %389 = vmatprep.subr.bf16.mxu0 %v388_v8  ;;  %v420_v34 = vpack.c.bf16 %v171_v33, %v170_v32  ;;  %v174_v37 = vld [vmem:[#allocation4 + $0x40] sm:$0xff]  ;;  %v424_v38 = vpack.c.bf16 %v173_v36, %v172_v35  ;;  %v175_v39 = vld [vmem:[#allocation4 + $0x48] sm:$0xff]  ;;  %v176_v41 = vld [vmem:[#allocation4 + $0x50] sm:$0xff] }
  0x2f   :  { %417 = vmatprep.subr.bf16.mxu1 %v416_v31  ;;  %v428_v40 = vpack.c.bf16 %v175_v39, %v174_v37  ;;  %v177_v42 = vld [vmem:[#allocation4 + $0x58] sm:$0xff]  ;;  %v178_v44 = vld [vmem:[#allocation4 + $0x60] sm:$0xff]  ;;  %v179_v45 = vld [vmem:[#allocation4 + $0x68] sm:$0xff] }
  0x30   :  { %419 = vmatpush3.bf16.msra.mxu1 %v416_v31  ;;  %v432_v43 = vpack.c.bf16 %v177_v42, %v176_v41  ;;  %v436_v46 = vpack.c.bf16 %v179_v45, %v178_v44  ;;  %v180_v47 = vld [vmem:[#allocation4 + $0x70] sm:$0xff]  ;;  %v181_v48 = vld [vmem:[#allocation4 + $0x78] sm:$0xff]  ;;  %v272_v50 = vld [vmem:[%s578_s2] ss:$0 sm:$0xff] }
  0x31   :  { %391 = vmatpush3.bf16.msra.mxu0 %v388_v8  ;;  %421 = vmatprep.subr.bf16.mxu1 %v420_v34  ;;  %v440_v49 = vpack.c.bf16 %v181_v48, %v180_v47  ;;  %v273_v9 = vld [vmem:[%s580_s4] ss:$0 sm:$0xff] }
  0x32   :  { %393 = vmatprep.subr.bf16.mxu0 %v392_v15 }
  0x34   :  { %423 = vmatpush3.bf16.msra.mxu1 %v420_v34 }
  0x35   :  { %395 = vmatpush3.bf16.msra.mxu0 %v392_v15  ;;  %425 = vmatprep.subr.bf16.mxu1 %v424_v38 }
  0x36   :  { %397 = vmatprep.subr.bf16.mxu0 %v396_v18 }
  0x38   :  { %427 = vmatpush3.bf16.msra.mxu1 %v424_v38 }
  0x39   :  { %399 = vmatpush3.bf16.msra.mxu0 %v396_v18  ;;  %429 = vmatprep.subr.bf16.mxu1 %v428_v40 }
  0x3a   :  { %401 = vmatprep.subr.bf16.mxu0 %v400_v21 }
  0x3c   :  { %431 = vmatpush3.bf16.msra.mxu1 %v428_v40 }
  0x3d   :  { %403 = vmatpush3.bf16.msra.mxu0 %v400_v21  ;;  %433 = vmatprep.subr.bf16.mxu1 %v432_v43 }
  0x3e   :  { %405 = vmatprep.subr.bf16.mxu0 %v404_v24 }
  0x40   :  { %435 = vmatpush3.bf16.msra.mxu1 %v432_v43 }
  0x41   :  { %407 = vmatpush3.bf16.msra.mxu0 %v404_v24  ;;  %437 = vmatprep.subr.bf16.mxu1 %v436_v46 }
  0x42   :  { %409 = vmatprep.subr.bf16.mxu0 %v408_v27 }
  0x44   :  { %439 = vmatpush3.bf16.msra.mxu1 %v436_v46 }
  0x45   :  { %411 = vmatpush3.bf16.msra.mxu0 %v408_v27  ;;  %441 = vmatprep.subr.bf16.mxu1 %v440_v49 }
  0x48   :  { %343 = vmatmul.mubr.f32.vlgmr.msra.gmra.mrb[0].mxu0 %v49_v28  ;;  %443 = vmatpush3.bf16.msra.mxu1 %v440_v49 }
 0x11b   :  { %v344_v51 = vpop.f32.mrb[0].mxu0 }
 0x11c   :  { %v145_v52 = vadd.f32 %v344_v51, %v272_v50  ;;  %v139_v53 = vpop.f32.mrb[1].mxu0 }
 0x11d   :  { %v140_v54 = vadd.f32 %v272_v50, %v139_v53 }
 0x11e   :  { %v151_v55 = vmul.f32 0.044715, %v145_v52  ;;  %v149_v6 = vmul.f32 0.5, %v145_v52 }
 0x11f   :  { %v150_v56 = vmul.f32 0.044715, %v140_v54  ;;  %v148_v4 = vmul.f32 0.5, %v140_v54 }
 0x120   :  { %v153_v57 = vmul.f32 %v151_v55, %v145_v52 }
 0x121   :  { %v152_v58 = vmul.f32 %v150_v56, %v140_v54 }
 0x122   :  { %v155_v59 = vmul.f32 %v153_v57, %v145_v52 }
 0x123   :  { %v154_v60 = vmul.f32 %v152_v58, %v140_v54 }
 0x124   :  { %v157_v61 = vadd.f32 %v155_v59, %v145_v52 }
 0x125   :  { %v156_v62 = vadd.f32 %v154_v60, %v140_v54 }
 0x126   :  { %v159_v63 = vmul.f32 0.7978846, %v157_v61 }
 0x127   :  { %v158_v0 = vmul.f32 0.7978846, %v156_v62 }
 0x128   :  { %448 = vtanh.f32 %v159_v63 }
 0x129   :  { %450 = vtanh.f32 %v158_v0 }
 0x132   :  { %v449_v1 = vpop.eup %448 }
 0x133   :  { %v451_v2 = vpop.eup %450  ;;  %v163_v3 = vadd.f32 1.0, %v449_v1 }
 0x134   :  { %v162_v5 = vadd.f32 1.0, %v451_v2 }
 0x135   :  { %v165_v8 = vmul.f32 %v163_v3, %v149_v6 }
 0x136   :  { %v164_v7 = vmul.f32 %v162_v5, %v148_v4 }
 0x138   :  { %377 = vmatprep.mubr.f32.mxu1 %v164_v7 }
 0x139   :  { %378 = vmatmul.mubr.f32.vlgmr.msra.gmra.mrb[0].mxu1 %v165_v8 }
 0x20c   :  { %v379_v10 = vpop.f32.mrb[0].mxu1 }
 0x20d   :  { %v261_v11 = vadd.f32 %v379_v10, %v273_v9  ;;  %v255_v12 = vpop.f32.mrb[1].mxu1 }
 0x20e   :  { %v256_v13 = vadd.f32 %v273_v9, %v255_v12 }
 0x20f   :  { %265 = vst [vmem:[%s581_s5 + $0x8] sm:$0xff] %v261_v11 }
 0x210   :  { %264 = vst [vmem:[%s581_s5] sm:$0xff] %v256_v13 }
 0x211   :  { %270 = vsyncpa [#allocation3], 1 }
 0x212   :  { %271 = vsyncpa [#allocation5], 1 }

</bundles_post_ra>
